<compile_context>
chip_gen: v7x
topology: tpu7x:2x2x1
jax: 0.10.0
libtpu: 0.0.40
codegen_flags: <defaults>
</compile_context>

<pallas_src>
import functools

import jax
import jax.numpy as jnp
from jax.experimental import pallas as pl
from jax.experimental.pallas import tpu as pltpu

EPS = 1e-5


def _vmem_params():
    """Generation-aware (scoped-VMEM limit, per-block byte budget)."""
    try:
        vmem_bytes = int(pltpu.get_tpu_info().vmem_capacity_bytes)
    except Exception:
        vmem_bytes = 64 * 1024 * 1024  # conservative: v7x per-TC VMEM
    limit = min((vmem_bytes * 3) // 4, 64 * 1024 * 1024)  # 64 MiB v5e/v6e, 48 MiB v7x
    return limit // 8, limit                              # ~8 MiB / ~6 MiB blocks


def _pick_tiles(n, c, l, itemsize, budget):
    """Choose (batch_tile, l_tile) so a (bt, C, lt) block fits `budget` bytes.

    l_tile is either the full L or a multiple of 128 dividing L (lane-dense,
    unmasked stores); batch_tile divides N.
    """
    if c * l * itemsize <= budget:
        l_tile = l
    else:
        l_tile = None
        t = 128
        while t <= l:
            if l % t == 0 and c * t * itemsize <= budget:
                l_tile = t
            t += 128
        if l_tile is None:
            # TODO(synk): L not tileable into 128-multiples under the budget;
            # fall back to a full-L block (may need a larger vmem limit).
            l_tile = l
    bt = max(1, min(n, budget // max(1, c * l_tile * itemsize)))
    while n % bt:
        bt -= 1
    return bt, l_tile


def _bn_stats_kernel(x_ref, gamma_ref, beta_ref, scale_ref, shift_ref,
                     sum_sc, sq_sc, *, inv_count):
    """Pass 1 over grid (L tiles, N tiles): per-channel sum / sumsq -> scale/shift.

    Batch-axis partials accumulate in (1, C, l_tile) f32 scratch (pure VPU adds);
    the XLU lane reduce runs once per L tile; the last step folds gamma/beta.
    """
    li = pl.program_id(0)
    ni = pl.program_id(1)
    last_l = pl.num_programs(0) - 1
    last_n = pl.num_programs(1) - 1

    @pl.when((li == 0) & (ni == 0))
    def _init_out():
        scale_ref[...] = jnp.zeros_like(scale_ref)   # holds running sum
        shift_ref[...] = jnp.zeros_like(shift_ref)   # holds running sumsq

    @pl.when(ni == 0)
    def _init_scratch():
        sum_sc[...] = jnp.zeros_like(sum_sc)
        sq_sc[...] = jnp.zeros_like(sq_sc)

    x = x_ref[...].astype(jnp.float32)
    sum_sc[...] += jnp.sum(x, axis=0, keepdims=True)      # VPU-only adds
    sq_sc[...] += jnp.sum(x * x, axis=0, keepdims=True)

    @pl.when(ni == last_n)
    def _lane_reduce():                                    # one XLU reduce per L tile
        scale_ref[...] += jnp.sum(sum_sc[...], axis=2, keepdims=True)
        shift_ref[...] += jnp.sum(sq_sc[...], axis=2, keepdims=True)

    @pl.when((li == last_l) & (ni == last_n))
    def _finalize():
        mean = scale_ref[...] * inv_count
        # TODO(synk): E[x^2]-mean^2 can cancel when |mean| >> std; use shifted
        # sums if inputs carry large per-channel offsets.
        var = jnp.maximum(shift_ref[...] * inv_count - mean * mean, 0.0)
        scale = jax.lax.rsqrt(var + EPS) * gamma_ref[...].astype(jnp.float32)
        shift_ref[...] = beta_ref[...].astype(jnp.float32) - mean * scale
        scale_ref[...] = scale


def _bn_norm_kernel(x_ref, scale_ref, shift_ref, o_ref):
    """Pass 2: y = x * scale + shift (scale/shift are per-channel (1, C, 1))."""
    x = x_ref[...].astype(jnp.float32)
    o_ref[...] = (x * scale_ref[...] + shift_ref[...]).astype(o_ref.dtype)


def _bn_fused_kernel(x_ref, gamma_ref, beta_ref, o_ref, *, inv_count):
    """Single-pass BN for inputs that fit in VMEM: read x once, write y once."""
    x = x_ref[...].astype(jnp.float32)
    mean = jnp.sum(x, axis=(0, 2), keepdims=True) * inv_count
    var = jnp.maximum(
        jnp.sum(x * x, axis=(0, 2), keepdims=True) * inv_count - mean * mean, 0.0)
    scale = jax.lax.rsqrt(var + EPS) * gamma_ref[...].astype(jnp.float32)
    shift = beta_ref[...].astype(jnp.float32) - mean * scale
    o_ref[...] = (x * scale + shift).astype(o_ref.dtype)


def switchable_batchnorm1d(x, gammas, betas,
                           width_mult_list=(1.0, 0.75, 0.5, 0.25),
                           width_mult=None,
                           block_byte_budget=None,
                           vmem_limit_bytes=None,
                           force_two_pass=False):
    """x: (N, C, L) with C == num_features_list[idx]. gammas/betas: per-width params."""
    if width_mult is None:
        width_mult = max(width_mult_list)
    idx = list(width_mult_list).index(width_mult)

    N, C, L = x.shape
    gamma = jnp.asarray(gammas[idx], jnp.float32).reshape(1, C, 1)
    beta = jnp.asarray(betas[idx], jnp.float32).reshape(1, C, 1)

    default_budget, default_limit = _vmem_params()
    budget = block_byte_budget or default_budget
    vmem_limit = vmem_limit_bytes or default_limit
    inv_count = 1.0 / float(N * L)
    ch_shape = (1, C, 1)

    # ---- Fused single-pass path (small x): 2 HBM passes instead of 3.
    if not force_two_pass and 6 * N * C * L * 4 <= vmem_limit:
        full_spec = pl.BlockSpec((N, C, L), lambda i: (0, 0, 0))
        ch_spec = pl.BlockSpec(ch_shape, lambda i: (0, 0, 0))
        return pl.pallas_call(
            functools.partial(_bn_fused_kernel, inv_count=inv_count),
            out_shape=jax.ShapeDtypeStruct((N, C, L), x.dtype),
            grid=(1,),
            in_specs=[full_spec, ch_spec, ch_spec],
            out_specs=full_spec,
            compiler_params=pltpu.CompilerParams(
                dimension_semantics=("arbitrary",),
                vmem_limit_bytes=vmem_limit),
        )(x, gamma, beta)

    # ---- Two-pass path with N- and L-tiling.
    batch_tile, l_tile = _pick_tiles(N, C, L, x.dtype.itemsize, budget)
    n_tiles, l_tiles = N // batch_tile, L // l_tile
    ch_spec = pl.BlockSpec(ch_shape, lambda *_: (0, 0, 0))

    # Pass 1: per-channel scale/shift (L tiles outer, N tiles inner, sequential).
    scale, shift = pl.pallas_call(
        functools.partial(_bn_stats_kernel, inv_count=inv_count),
        out_shape=(jax.ShapeDtypeStruct(ch_shape, jnp.float32),
                   jax.ShapeDtypeStruct(ch_shape, jnp.float32)),
        grid=(l_tiles, n_tiles),
        in_specs=[pl.BlockSpec((batch_tile, C, l_tile), lambda li, ni: (ni, 0, li)),
                  ch_spec, ch_spec],
        out_specs=(ch_spec, ch_spec),
        scratch_shapes=[pltpu.VMEM((1, C, l_tile), jnp.float32),
                        pltpu.VMEM((1, C, l_tile), jnp.float32)],
        compiler_params=pltpu.CompilerParams(
            dimension_semantics=("arbitrary", "arbitrary"),
            vmem_limit_bytes=vmem_limit),
    )(x, gamma, beta)

    # Pass 2: normalize + affine; tiles are independent -> parallel (megacore).
    x_spec2 = pl.BlockSpec((batch_tile, C, l_tile), lambda ni, li: (ni, 0, li))
    return pl.pallas_call(
        _bn_norm_kernel,
        out_shape=jax.ShapeDtypeStruct((N, C, L), x.dtype),
        grid=(n_tiles, l_tiles),
        in_specs=[x_spec2, ch_spec, ch_spec],
        out_specs=x_spec2,
        compiler_params=pltpu.CompilerParams(
            dimension_semantics=("parallel", "parallel"),
            vmem_limit_bytes=vmem_limit),
    )(x, scale, shift)


def _reference(x, gamma, beta):
    x32 = x.astype(jnp.float32)
    mean = jnp.mean(x32, axis=(0, 2), keepdims=True)
    var = jnp.mean((x32 - mean) ** 2, axis=(0, 2), keepdims=True)
    y = (x32 - mean) * jax.lax.rsqrt(var + EPS)
    return (y * gamma[None, :, None] + beta[None, :, None]).astype(x.dtype)


if __name__ == "__main__":
    key = jax.random.PRNGKey(0)

    # Module config: num_features_list = [8, 6, 4, 2].
    num_features_list = [8, 6, 4, 2]
    width_mult_list = [1.0, 0.75, 0.5, 0.25]

    # Deterministic synthetic affine parameters for each BN in the ModuleList.
    gammas, betas = [], []
    for nf in num_features_list:
        key, kg, kb = jax.random.split(key, 3)
        gammas.append(1.0 + 0.1 * jax.random.normal(kg, (nf,), dtype=jnp.float32))
        betas.append(0.1 * jax.random.normal(kb, (nf,), dtype=jnp.float32))

    def check(y, ref, tol=5e-4):
        assert y.shape == ref.shape and y.dtype == ref.dtype
        assert float(jnp.max(jnp.abs(y - ref))) < tol

    # Case 1: width_mult = 1.0 -> idx 0 -> C = 8; small x -> fused single-pass path.
    key, kx1 = jax.random.split(key)
    x1 = jax.random.normal(kx1, (4, 8, 128), dtype=jnp.float32)
    y1 = jax.block_until_ready(
        switchable_batchnorm1d(x1, gammas, betas, width_mult_list))
    check(y1, _reference(x1, gammas[0], betas[0]))

    # Case 2: switch width_mult = 0.75 -> idx 1 -> C = 6; tiny non-128 L (fused path).
    key, kx2 = jax.random.split(key)
    x2 = jax.random.normal(kx2, (2, 6, 16), dtype=jnp.float32)
    y2 = jax.block_until_ready(
        switchable_batchnorm1d(x2, gammas, betas, width_mult_list, width_mult=0.75))
    check(y2, _reference(x2, gammas[1], betas[1]))

    # Case 3: force the two-pass path with both N-tiling and 128-lane L-tiling
    # (budget forces batch_tile=1, l_tile=128 -> grid (2, 2) in pass 1).
    key, kx3 = jax.random.split(key)
    x3 = jax.random.normal(kx3, (2, 8, 256), dtype=jnp.float32)
    y3 = jax.block_until_ready(
        switchable_batchnorm1d(x3, gammas, betas, width_mult_list,
                               force_two_pass=True,
                               block_byte_budget=8 * 128 * 4))
    check(y3, _reference(x3, gammas[0], betas[0]))

    print("KERNEL_OK")
</pallas_src>

<mosaic_0001>
module attributes {stable_mosaic.version = 11 : i64} {
  func.func @_bn_fused_kernel(%arg0: i32, %arg1: memref<4x8x128xf32, #tpu.memory_space<vmem>>, %arg2: memref<1x8x1xf32, #tpu.memory_space<vmem>>, %arg3: memref<1x8x1xf32, #tpu.memory_space<vmem>>, %arg4: memref<4x8x128xf32, #tpu.memory_space<vmem>>) attributes {dimension_semantics = [#tpu.dimension_semantics<arbitrary>], iteration_bounds = array<i64: 1>, scalar_prefetch = 0 : i64, scratch_operands = 0 : i64, tpu.core_type = #tpu.core_type<tc>, window_params = [{pipeline_mode = #tpu.pipeline_mode<synchronous>, transform_indices = @transform_0, window_bounds = array<i64: 4, 8, 128>}, {pipeline_mode = #tpu.pipeline_mode<synchronous>, transform_indices = @transform_1, window_bounds = array<i64: 1, 8, 1>}, {pipeline_mode = #tpu.pipeline_mode<synchronous>, transform_indices = @transform_2, window_bounds = array<i64: 1, 8, 1>}, {pipeline_mode = #tpu.pipeline_mode<synchronous>, transform_indices = @transform_3, window_bounds = array<i64: 4, 8, 128>}]} {
    %c0 = arith.constant 0 : index
    %c0_0 = arith.constant 0 : index
    %c0_1 = arith.constant 0 : index
    %0 = vector.load %arg1[%c0, %c0_0, %c0_1] : memref<4x8x128xf32, #tpu.memory_space<vmem>>, vector<4x8x128xf32>
    %cst = arith.constant dense<0.000000e+00> : vector<8xf32>
    %1 = vector.multi_reduction <add>, %0, %cst [0, 2] : vector<4x8x128xf32> to vector<8xf32>
    %2 = vector.shape_cast %1 : vector<8xf32> to vector<1x8x1xf32>
    %cst_2 = arith.constant 0.001953125 : f32
    %3 = vector.broadcast %cst_2 : f32 to vector<1x8x1xf32>
    %4 = arith.mulf %2, %3 : vector<1x8x1xf32>
    %5 = arith.mulf %0, %0 : vector<4x8x128xf32>
    %cst_3 = arith.constant dense<0.000000e+00> : vector<8xf32>
    %6 = vector.multi_reduction <add>, %5, %cst_3 [0, 2] : vector<4x8x128xf32> to vector<8xf32>
    %7 = vector.shape_cast %6 : vector<8xf32> to vector<1x8x1xf32>
    %cst_4 = arith.constant 0.001953125 : f32
    %8 = vector.broadcast %cst_4 : f32 to vector<1x8x1xf32>
    %9 = arith.mulf %7, %8 : vector<1x8x1xf32>
    %10 = arith.mulf %4, %4 : vector<1x8x1xf32>
    %11 = arith.subf %9, %10 : vector<1x8x1xf32>
    %cst_5 = arith.constant 0.000000e+00 : f32
    %12 = vector.broadcast %cst_5 : f32 to vector<1x8x1xf32>
    %13 = arith.maximumf %11, %12 : vector<1x8x1xf32>
    %cst_6 = arith.constant 9.99999974E-6 : f32
    %14 = vector.broadcast %cst_6 : f32 to vector<1x8x1xf32>
    %15 = arith.addf %13, %14 : vector<1x8x1xf32>
    %16 = math.rsqrt %15 : vector<1x8x1xf32>
    %c0_7 = arith.constant 0 : index
    %c0_8 = arith.constant 0 : index
    %c0_9 = arith.constant 0 : index
    %17 = vector.load %arg2[%c0_7, %c0_8, %c0_9] : memref<1x8x1xf32, #tpu.memory_space<vmem>>, vector<1x8x1xf32>
    %18 = arith.mulf %16, %17 : vector<1x8x1xf32>
    %c0_10 = arith.constant 0 : index
    %c0_11 = arith.constant 0 : index
    %c0_12 = arith.constant 0 : index
    %19 = vector.load %arg3[%c0_10, %c0_11, %c0_12] : memref<1x8x1xf32, #tpu.memory_space<vmem>>, vector<1x8x1xf32>
    %20 = arith.mulf %4, %18 : vector<1x8x1xf32>
    %21 = arith.subf %19, %20 : vector<1x8x1xf32>
    %22 = vector.broadcast %18 : vector<1x8x1xf32> to vector<4x8x128xf32>
    %23 = arith.mulf %0, %22 : vector<4x8x128xf32>
    %24 = vector.broadcast %21 : vector<1x8x1xf32> to vector<4x8x128xf32>
    %25 = arith.addf %23, %24 : vector<4x8x128xf32>
    %c0_13 = arith.constant 0 : index
    %c0_14 = arith.constant 0 : index
    %c0_15 = arith.constant 0 : index
    %26 = vector.load %arg4[%c0_13, %c0_14, %c0_15] : memref<4x8x128xf32, #tpu.memory_space<vmem>>, vector<4x8x128xf32>
    tpu.vector_store %arg4[%c0_13, %c0_14, %c0_15], %25 {strides = array<i32>} : memref<4x8x128xf32, #tpu.memory_space<vmem>>, vector<4x8x128xf32>,
    return
  }
  func.func @transform_0(%arg0: i32) -> (i32, i32, i32) {
    %c0_i32 = arith.constant 0 : i32
    %c0_i32_0 = arith.constant 0 : i32
    %c0_i32_1 = arith.constant 0 : i32
    %c0_i32_2 = arith.constant 0 : i32
    return %c0_i32, %c0_i32_0, %c0_i32_1 : i32, i32, i32
  }
  func.func @transform_1(%arg0: i32) -> (i32, i32, i32) {
    %c0_i32 = arith.constant 0 : i32
    %c0_i32_0 = arith.constant 0 : i32
    %c0_i32_1 = arith.constant 0 : i32
    %c0_i32_2 = arith.constant 0 : i32
    return %c0_i32, %c0_i32_0, %c0_i32_1 : i32, i32, i32
  }
  func.func @transform_2(%arg0: i32) -> (i32, i32, i32) {
    %c0_i32 = arith.constant 0 : i32
    %c0_i32_0 = arith.constant 0 : i32
    %c0_i32_1 = arith.constant 0 : i32
    %c0_i32_2 = arith.constant 0 : i32
    return %c0_i32, %c0_i32_0, %c0_i32_1 : i32, i32, i32
  }
  func.func @transform_3(%arg0: i32) -> (i32, i32, i32) {
    %c0_i32 = arith.constant 0 : i32
    %c0_i32_0 = arith.constant 0 : i32
    %c0_i32_1 = arith.constant 0 : i32
    %c0_i32_2 = arith.constant 0 : i32
    return %c0_i32, %c0_i32_0, %c0_i32_1 : i32, i32, i32
  }
}

</mosaic_0001>

<bundles_post_ra>
// kernel: tpu_custom_call.1
= control target key start
LH: loop header
LB: loop body
LE: loop exit
PB: predicated region body
PF: predicated region fallthrough
CT: control target
= control target key end

     0   :  { %8 = vsyncpa [#allocation3], 0  ;;  %s216_s0 = inlined_call_operand.hbm [shape: f32[4,8,128], index: 0, kind: input, shape index: {}]   ;;  %s217_s1 = inlined_call_operand.vmem [shape: f32[1,8,1], index: 1, kind: input, shape index: {}]   ;;  %s218_s2 = inlined_call_operand.vmem [shape: f32[1,8,1], index: 2, kind: input, shape index: {}]   ;;  %s219_s3 = inlined_call_operand.hbm [shape: f32[4,8,128], index: 3, kind: output, shape index: {}]  }
   0x1   :  { %9 = vsyncpa [#allocation4], 0  ;;  %s155_s12 = smov [#allocation2]   ;;  %s107_s16 = scalar_lea.hbm %s216_s0, 512 }
   0x2   :  { %s15_s13 = sshll.u32 %s155_s12, 4  ;;  %p108_p0 = scmp.ne.s32.totalorder %s216_s0, %s107_s16  ;;  %s16_s13 = int_to_ptr.vmem [resolvable:$true] %s15_s13 }
   0x3   :  { %p111_p1 = scmp.lt.u32.totalorder %s107_s16, %s216_s0 }
   0x5   :  { %p113_p2 = pnand %p111_p1, %p108_p0 }
   0x7   :  { %116 = shalt.err (!%p113_p2)
}
   0x8   :  { %s117_s21 = scalar_lea.vmem %s16_s13, 512  ;;  %p122_p4 = scmp.lt.s32.totalorder %s16_s13, %s16_s13 }
   0x9   :  { %p118_p3 = scmp.ne.s32.totalorder %s16_s13, %s117_s21  ;;  %p123_p5 = scmp.lt.s32.totalorder %s117_s21, %s117_s21 }
   0xb   :  { %p124_p6 = por %p123_p5, %p122_p4 }
   0xd   :  { %p125_p7 = pnand %p124_p6, %p118_p3 }
   0xf   :  { %128 = shalt.err (!%p125_p7)
}
  0x10   :  { %s156_s22 = smov 128   ;;  %s157_s23 = smov 8  }
  0x11   :  { %21 = dma.hbm_to_vmem [thread:$0]  %s216_s0, 512, %s16_s13, [#allocation3], %s156_s22, %s156_s22, %s157_s23  }
  0x12   :  { %151 = dma.done.wait [#allocation3], 512  }
  0x13   :  { %152 = vsyncadd [#allocation3], 4294966784  ;;  %v29_v0 = vld [vmem:[#allocation2] sm:$0xff]  ;;  %v30_v1 = vld [vmem:[#allocation2 + $0x8] sm:$0xff]  ;;  %v158_v14 = vmov 0   ;;  %s159_s29 = smov [#allocation5]  }
  0x14   :  { %v31_v2 = vld [vmem:[#allocation2 + $0x10] sm:$0xff]  ;;  %v33_v3 = vadd.f32 %v30_v1, %v29_v0  ;;  %v39_v4 = vmul.f32 %v29_v0, %v29_v0  ;;  %v40_v5 = vmul.f32 %v30_v1, %v30_v1  ;;  %v32_v7 = vld [vmem:[#allocation2 + $0x18] sm:$0xff]  ;;  %103 = vset.pattern.permute.xlu1 %v158_v14  ;;  %104 = vset.pattern.permute.xlu0 %v158_v14  ;;  %v54_v23 = vld [vmem:[%s217_s1] sm:$0xff]  ;;  %s86_s30 = sshll.u32 %s159_s29, 4  ;;  %s87_s30 = int_to_ptr.vmem [resolvable:$true] %s86_s30 }
  0x15   :  { %v41_v6 = vmul.f32 %v31_v2, %v31_v2  ;;  %v42_v9 = vmul.f32 %v32_v7, %v32_v7  ;;  %v56_v26 = vld [vmem:[%s218_s2] sm:$0xff]  ;;  %s129_s1 = scalar_lea.vmem %s87_s30, 512  ;;  %p134_p9 = scmp.lt.s32.totalorder %s87_s30, %s87_s30 }
  0x16   :  { %v34_v8 = vadd.f32 %v33_v3, %v31_v2  ;;  %v43_v10 = vadd.f32 %v40_v5, %v39_v4  ;;  %p130_p8 = scmp.ne.s32.totalorder %s87_s30, %s129_s1  ;;  %p135_p10 = scmp.lt.s32.totalorder %s129_s1, %s129_s1 }
  0x18   :  { %v35_v11 = vadd.f32 %v34_v8, %v32_v7  ;;  %v44_v12 = vadd.f32 %v43_v10, %v41_v6  ;;  %p136_p11 = por %p135_p10, %p134_p9 }
  0x1a   :  { %36 = vadd.xlane.f32.xlu0 %v35_v11  ;;  %v45_v13 = vadd.f32 %v44_v12, %v42_v9  ;;  %p137_p12 = pnand %p136_p11, %p130_p8 }
  0x1e   :  { %46 = vadd.xlane.f32.xlu0 %v45_v13 }
  0xa7   :  { %v37_v15 = vpop.xlane.xlu0 %36 }
  0xa8   :  { %v38_v16 = vmul.f32 0.001953125, %v37_v15 }
  0xaa   :  { %v49_v18 = vmul.f32 %v38_v16, %v38_v16 }
  0xab   :  { %v47_v17 = vpop.xlane.xlu0 %46 }
  0xac   :  { %v48_v19 = vmul.f32 0.001953125, %v47_v17 }
  0xae   :  { %v50_v20 = vsub.f32 %v48_v19, %v49_v18 }
  0xb0   :  { %v51_v21 = vmax.f32 %v50_v20, 0.0 }
  0xb2   :  { %v52_v22 = vadd.f32 1e-05, %v51_v21 }
  0xb4   :  { %105 = vrsqrt.f32 %v52_v22 }
  0xbe   :  { %v106_v24 = vpop.eup %105 }
  0xbf   :  { %v55_v25 = vmul.f32 %v106_v24, %v54_v23 }
  0xc1   :  { %61 = vperm.xlu1 %103, %v55_v25   ;;  %v57_v27 = vmul.f32 %v55_v25, %v38_v16 }
  0xc3   :  { %v58_v28 = vsub.f32 %v56_v26, %v57_v27 }
  0xc5   :  { %70 = vperm.xlu1 %103, %v58_v28  }
 0x140   :  { %v62_v29 = vpop.permute.xlu1 %61 }
 0x141   :  { %v64_v30 = vmul.f32 %v62_v29, %v29_v0  ;;  %v65_v31 = vmul.f32 %v62_v29, %v30_v1  ;;  %v66_v32 = vmul.f32 %v62_v29, %v31_v2  ;;  %v67_v33 = vmul.f32 %v62_v29, %v32_v7 }
 0x144   :  { %v71_v34 = vpop.permute.xlu1 %70 }
 0x145   :  { %v73_v35 = vadd.f32 %v71_v34, %v64_v30  ;;  %v74_v36 = vadd.f32 %v71_v34, %v65_v31  ;;  %v75_v37 = vadd.f32 %v71_v34, %v66_v32  ;;  %v76_v38 = vadd.f32 %v71_v34, %v67_v33 }
 0x147   :  { %77 = vst [vmem:[#allocation5] sm:$0xff] %v73_v35  ;;  %78 = vst [vmem:[#allocation5 + $0x8] sm:$0xff] %v74_v36 }
 0x148   :  { %79 = vst [vmem:[#allocation5 + $0x10] sm:$0xff] %v75_v37  ;;  %80 = vst [vmem:[#allocation5 + $0x18] sm:$0xff] %v76_v38 }
 0x149   :  { %140 = shalt.err (!%p137_p12)
}
 0x14a   :  { %s141_s5 = scalar_lea.hbm %s219_s3, 512 }
 0x14b   :  { %p142_p13 = scmp.ne.s32.totalorder %s219_s3, %s141_s5  ;;  %p145_p0 = scmp.lt.u32.totalorder %s141_s5, %s219_s3 }
 0x14d   :  { %p147_p1 = pnand %p145_p0, %p142_p13 }
 0x14f   :  { %150 = shalt.err (!%p147_p1)
}
 0x150   :  { %92 = dma.vmem_to_hbm [thread:$0]  %s87_s30, 512, %s219_s3, [#allocation4], %s156_s22, %s156_s22, %s157_s23  }
 0x151   :  { %153 = dma.done.wait [#allocation4], 512  }
 0x152   :  { %154 = vsyncadd [#allocation4], 4294966784 }
 0x153   :  { %96 = vsyncpa [#allocation3], 1 }
 0x154   :  { %97 = vsyncpa [#allocation4], 1 }

</bundles_post_ra>
